<compile_context>
chip_gen: v7x
topology: tpu7x:2x2x1
jax: 0.10.0
libtpu: 0.0.40
codegen_flags: <defaults>
</compile_context>

<pallas_src>
import jax
import jax.numpy as jnp
from jax.experimental import pallas as pl
from jax.experimental.pallas import tpu as pltpu


def _round_up(x: int, m: int) -> int:
    return ((x + m - 1) // m) * m


def _cdiv(a: int, b: int) -> int:
    return (a + b - 1) // b


def _vmem_capacity_bytes() -> int:
    """Best-effort per-TensorCore VMEM capacity (v5e/v6e: 128 MiB, v7x: 64 MiB)."""
    try:
        info = pltpu.get_tpu_info()
        cap = getattr(info, "vmem_capacity_bytes", None)
        if cap:
            return int(cap)
    except Exception:
        pass
    return 64 * 1024 * 1024  # conservative default (v7x per-TC VMEM)


def _wigner_rotation_kernel(w_ref, x_ref, o_ref):
    # w_ref: (TB, dim_p, dim_p), x_ref: (TB, dim_p, TC), o_ref: (TB, dim_p, TC)
    # TODO(synk): for very small dim_p the batched einsum lowers to TB tiny MXU
    # matmuls per step; if a bundle dump ever shows the MXU/vext slot binding
    # before DMA, switch to a VPU FMA loop over j or a block-diagonal per-l path.
    o_ref[...] = jnp.einsum(
        "bij,bjc->bic",
        w_ref[...],
        x_ref[...],
        preferred_element_type=jnp.float32,
    ).astype(o_ref.dtype)


def dense_wigner_rotation(
    input_feats: jax.Array,
    wigner_d: jax.Array,
    *,
    compute_dtype=jnp.bfloat16,
    target_step_bytes: int | None = None,
) -> jax.Array:
    """output[b] = wigner_d[b] @ input_feats[b]

    input_feats: (B, dim, C)
    wigner_d:    (B, dim, dim)
    returns:     (B, dim, C), dtype of input_feats.

    compute_dtype: dtype the inputs are cast to before the kernel (default
    bfloat16 -> ~2x HBM traffic reduction; MXU accumulation stays f32 and the
    output keeps the original dtype). Pass None for full-precision inputs.
    """
    B, dim, C = input_feats.shape
    assert wigner_d.shape == (B, dim, dim), (wigner_d.shape, (B, dim, dim))

    out_dtype = input_feats.dtype
    if compute_dtype is not None:
        input_feats = input_feats.astype(compute_dtype)
        wigner_d = wigner_d.astype(compute_dtype)
    cdt = input_feats.dtype
    in_bytes = jnp.dtype(cdt).itemsize
    out_bytes = jnp.dtype(out_dtype).itemsize

    vmem_cap = _vmem_capacity_bytes()
    if target_step_bytes is None:
        # ~12.8 MiB on v7x (64 MiB VMEM, 3.2 TB/s HBM), 16 MiB on v5e/v6e.
        target_step_bytes = int(min(16 << 20, max(4 << 20, vmem_cap // 5)))

    # --- Tile / padding selection ------------------------------------------
    # Sublane alignment for the irreps dim: 8 rows for 4-byte, 16 for 2-byte.
    sublane = max(8, 32 // in_bytes)
    dim_p = _round_up(dim, sublane)

    # Lane-dense channel dim: pad only to a multiple of 128, then pick the
    # largest TC in {512, 384, 256, 128} dividing C_p (zero extra padding).
    C_p = _round_up(C, 128)
    TC = 128
    for cand in (512, 384, 256, 128):
        if C_p % cand == 0:
            TC = cand
            break

    # Balanced batch tile: size TB so a grid step carries ~target_step_bytes,
    # then split B into `steps` nearly equal chunks (padding < steps elements).
    step_bytes_per_b = dim_p * dim_p * in_bytes + dim_p * TC * (in_bytes + out_bytes)
    tb_cap = max(1, min(B, target_step_bytes // max(1, step_bytes_per_b)))
    steps_b = _cdiv(B, tb_cap)
    if B >= 2 and steps_b % 2 == 1:
        steps_b += 1  # even step count: v7x has 2 TensorCores per chip
    TB = _cdiv(B, steps_b)
    B_p = steps_b * TB

    # --- Wrapper-side zero padding -----------------------------------------
    x_p = input_feats
    w_p = wigner_d
    if (B_p, dim_p, C_p) != (B, dim, C):
        x_p = jnp.pad(x_p, ((0, B_p - B), (0, dim_p - dim), (0, C_p - C)))
    if (B_p, dim_p) != (B, dim):
        w_p = jnp.pad(w_p, ((0, B_p - B), (0, dim_p - dim), (0, dim_p - dim)))

    grid = (steps_b, C_p // TC)

    # VMEM limit: double-buffered per-step footprint + headroom, capped safely
    # below physical capacity (never request the full 64 MiB on v7x).
    step_bytes = TB * step_bytes_per_b
    vmem_limit = int(min(vmem_cap - (8 << 20),
                         max(32 << 20, 2 * step_bytes + (4 << 20))))

    cost = pl.CostEstimate(
        flops=2 * B_p * dim_p * dim_p * C_p,
        transcendentals=0,
        bytes_accessed=in_bytes * B_p * dim_p * (dim_p + C_p)
        + out_bytes * B_p * dim_p * C_p,
    )

    out_p = pl.pallas_call(
        _wigner_rotation_kernel,
        out_shape=jax.ShapeDtypeStruct((B_p, dim_p, C_p), out_dtype),
        grid_spec=pltpu.PrefetchScalarGridSpec(
            num_scalar_prefetch=0,
            grid=grid,
            in_specs=[
                # Wigner block: same block across the channel axis -> stays
                # resident in VMEM while we sweep channels for that batch tile.
                # TODO(synk): if a bundle dump ever shows exposed W-DMA latency
                # (narrow dim_p rows), stage W as a lane-dense (B, dim*dim) slab.
                pl.BlockSpec((TB, dim_p, dim_p), lambda b, c: (b, 0, 0)),
                # Feature slab: tiled over batch and channels.
                pl.BlockSpec((TB, dim_p, TC), lambda b, c: (b, 0, c)),
            ],
            out_specs=pl.BlockSpec((TB, dim_p, TC), lambda b, c: (b, 0, c)),
        ),
        compiler_params=pltpu.CompilerParams(
            # Keep any cross-core (megacore) split on the batch axis only.
            dimension_semantics=("parallel", "arbitrary"),
            vmem_limit_bytes=vmem_limit,
        ),
        cost_estimate=cost,
    )(w_p, x_p)

    if (B_p, dim_p, C_p) != (B, dim, C):
        out_p = out_p[:B, :dim, :C]
    return out_p


class DenseWignerRotation:
    """JAX/Pallas port of equitorch's DenseWignerRotation.

    The module has no learnable parameters; `irreps` only fixes the feature
    dimension `irreps.dim`, represented here by an integer.
    """

    def __init__(self, irreps_dim: int, compute_dtype=jnp.bfloat16):
        self.irreps_dim = irreps_dim
        self.compute_dtype = compute_dtype

    def __call__(self, input_feats: jax.Array, wigner_d: jax.Array) -> jax.Array:
        assert input_feats.shape[1] == self.irreps_dim
        assert wigner_d.shape[1] == self.irreps_dim
        assert wigner_d.shape[2] == self.irreps_dim
        return dense_wigner_rotation(
            input_feats, wigner_d, compute_dtype=self.compute_dtype
        )


if __name__ == "__main__":
    # Small, deterministic example: dim = 16 (e.g. irreps 0+1+2+3: 1+3+5+7).
    B = 2          # batch
    DIM = 16       # irreps.dim
    C = 32         # channels

    key = jax.random.PRNGKey(0)
    k1, k2 = jax.random.split(key)
    x = jax.random.normal(k1, (B, DIM, C), dtype=jnp.float32)
    # Synthetic "Wigner D" matrices (deterministic); in practice these are
    # block-diagonal orthogonal matrices produced by a WignerD module.
    wd = jax.random.normal(k2, (B, DIM, DIM), dtype=jnp.float32)

    ref = jnp.einsum("bij,bjc->bic", wd, x)

    # Full-precision path: tight check.
    out_f32 = dense_wigner_rotation(x, wd, compute_dtype=None)
    out_f32 = jax.block_until_ready(out_f32)
    assert out_f32.shape == (B, DIM, C)
    assert out_f32.dtype == x.dtype
    assert jnp.allclose(out_f32, ref, atol=1e-5, rtol=1e-5)

    # Default module path: bf16 inputs, f32 MXU accumulation, f32 output.
    module = DenseWignerRotation(DIM)
    out = jax.block_until_ready(module(x, wd))
    assert out.shape == (B, DIM, C)
    assert out.dtype == x.dtype
    assert jnp.allclose(out, ref, atol=1e-1, rtol=5e-2)

    print("KERNEL_OK")
</pallas_src>

<mosaic_0001>
module attributes {stable_mosaic.version = 11 : i64} {
  func.func @_wigner_rotation_kernel(%arg0: i32, %arg1: i32, %arg2: memref<1x16x16xf32, #tpu.memory_space<vmem>>, %arg3: memref<1x16x128xf32, #tpu.memory_space<vmem>>, %arg4: memref<1x16x128xf32, #tpu.memory_space<vmem>>) attributes {dimension_semantics = [#tpu.dimension_semantics<parallel>, #tpu.dimension_semantics<arbitrary>], iteration_bounds = array<i64: 2, 1>, scalar_prefetch = 0 : i64, scratch_operands = 0 : i64, tpu.core_type = #tpu.core_type<tc>, window_params = [{transform_indices = @transform_0, window_bounds = array<i64: 1, 16, 16>}, {transform_indices = @transform_1, window_bounds = array<i64: 1, 16, 128>}, {transform_indices = @transform_2, window_bounds = array<i64: 1, 16, 128>}]} {
    %c0 = arith.constant 0 : index
    %c0_0 = arith.constant 0 : index
    %c0_1 = arith.constant 0 : index
    %0 = vector.load %arg2[%c0, %c0_0, %c0_1] : memref<1x16x16xf32, #tpu.memory_space<vmem>>, vector<1x16x16xf32>
    %c0_2 = arith.constant 0 : index
    %c0_3 = arith.constant 0 : index
    %c0_4 = arith.constant 0 : index
    %1 = vector.load %arg3[%c0_2, %c0_3, %c0_4] : memref<1x16x128xf32, #tpu.memory_space<vmem>>, vector<1x16x128xf32>
    "tpu.trace_start"() <{level = 10 : i32, message = "bij,bjc->bic"}> : () -> ()
    %cst = arith.constant dense<0.000000e+00> : vector<1x16x128xf32>
    %2 = tpu.matmul %0, %1, %cst {dimension_numbers = #tpu.dot_dimension_numbers<[2], [1], [1], [2], [0, 0, 0, 1, 1, 2], [0], [0]>} : vector<1x16x16xf32>, vector<1x16x128xf32>, vector<1x16x128xf32> -> vector<1x16x128xf32>
    "tpu.trace_stop"() : () -> ()
    %c0_5 = arith.constant 0 : index
    %c0_6 = arith.constant 0 : index
    %c0_7 = arith.constant 0 : index
    %3 = vector.load %arg4[%c0_5, %c0_6, %c0_7] : memref<1x16x128xf32, #tpu.memory_space<vmem>>, vector<1x16x128xf32>
    tpu.vector_store %arg4[%c0_5, %c0_6, %c0_7], %2 {strides = array<i32>} : memref<1x16x128xf32, #tpu.memory_space<vmem>>, vector<1x16x128xf32>,
    return
  }
  func.func @transform_0(%arg0: i32, %arg1: i32) -> (i32, i32, i32) {
    %c0_i32 = arith.constant 0 : i32
    %c0_i32_0 = arith.constant 0 : i32
    %c0_i32_1 = arith.constant 0 : i32
    return %arg0, %c0_i32, %c0_i32_0 : i32, i32, i32
  }
  func.func @transform_1(%arg0: i32, %arg1: i32) -> (i32, i32, i32) {
    %c0_i32 = arith.constant 0 : i32
    %c0_i32_0 = arith.constant 0 : i32
    return %arg0, %c0_i32, %arg1 : i32, i32, i32
  }
  func.func @transform_2(%arg0: i32, %arg1: i32) -> (i32, i32, i32) {
    %c0_i32 = arith.constant 0 : i32
    %c0_i32_0 = arith.constant 0 : i32
    return %arg0, %c0_i32, %arg1 : i32, i32, i32
  }
}

</mosaic_0001>

<bundles_post_ra>
// kernel: tpu_custom_call.1
= control target key start
LH: loop header
LB: loop body
LE: loop exit
PB: predicated region body
PF: predicated region fallthrough
CT: control target
= control target key end

     0   :  { %7 = vsyncpa [#allocation3], 0  ;;  %s946_s0 = inlined_call_operand.hbm [shape: f32[2,16,16], index: 0, kind: input, shape index: {}]   ;;  %s947_s1 = inlined_call_operand.hbm [shape: f32[2,16,128], index: 1, kind: input, shape index: {}]   ;;  %s948_s2 = inlined_call_operand.hbm [shape: f32[2,16,128], index: 2, kind: output, shape index: {}]  }
   0x1   :  { %9 = vsyncpa [#allocation3 + $0x1], 0 }
   0x2   :  { %10 = vsyncpa [#allocation6], 0 }
   0x3   :  { %12 = vsyncpa [#allocation6 + $0x1], 0 }
   0x4   :  { %13 = vsyncpa [#allocation4], 0 }
   0x5   :  { %15 = vsyncpa [#allocation4 + $0x1], 0  ;;  %s710_s9 = smov 0   ;;  %s712_s10 = smov 0  }
   0x6   :  { %s714_s11 = smov 0   ;;  %s716_s12 = smov 0  }
   0x7   :  { %s718_s13 = smov 0   ;;  %s720_s14 = smov 0  }
   0x8 LB: > { %s430_s15 = sadd.s32 4294967295, %s686_s14   ;;  %s431_s16 = sadd.s32 4294967294, %s686_s14   ;;  %s686_s14 = sphi %s720_s14, %s21_s14   ;;  %s682_s13 = sphi %s718_s13, %s966_s13   ;;  %s678_s12 = sphi %s716_s12, %s965_s12   ;;  %s674_s11 = sphi %s714_s11, %s964_s11   ;;  %s670_s10 = sphi %s712_s10, %s963_s10   ;;  %s666_s9 = sphi %s710_s9, %s962_s9  }
   0x9   : > { %s33_s17 = sadd.s32 1, %s682_s13  ;;  %s40_s18 = sadd.s32 1, %s674_s11 }
   0xa   : > { %p35_p0 = scmp.ge.s32.totalorder %s33_s17, 2  ;;  %p47_p1 = scmp.ne.s32.totalorder %s674_s11, %s670_s10 }
   0xb   : > { %p48_p2 = scmp.eq.s32.totalorder %s686_s14, 0  ;;  %p53_p3 = scmp.ne.s32.totalorder %s670_s10, %s666_s9 }
   0xc   : > { %s968_s17 = smov (%p35_p0, %s33_s17), 0  ;;  %p54_p5 = scmp.eq.s32.totalorder %s430_s15, 0 }
   0xd   : > { %p751_p4 = por %p48_p2, %p47_p1  ;;  %s37_s20 = ssub.s32 %s682_s13, %s968_s17 }
   0xe   : > { %p107_p6 = scmp.eq.s32.totalorder %s430_s15, 1  ;;  %p38_p7 = scmp.eq.s32.totalorder %s37_s20, 0 }
   0xf   : > { %p757_p8 = por %p54_p5, %p53_p3  ;;  %p113_p10 = scmp.eq.s32.totalorder %s431_s16, 1 }
  0x10   : > { %p761_p9 = por %p107_p6, %p47_p1  ;;  %p486_p13 = scmp.lt.s32.totalorder %s686_s14, 2 }
  0x11   : > { %s952_s21 = scalar_select %p757_p8, 1, 0 }
  0x12   : > { %s953_s22 = scalar_select %p761_p9, 1, 0 }
  0x13   : > { %s766_s23 = scalar_select %p38_p7, %s674_s11, %s40_s18  }
  0x14   : > { %p768_p11 = por %p113_p10, %p53_p3  ;;  %s775_s25 = sand.u32 1, %s674_s11  }
  0x15   : > { %s434_s26 = sshll.u32 %s775_s25, 4  ;;  %s451_s27 = sshll.u32 %s682_s13, 8 }
  0x16   : > { %s954_s24 = scalar_select %p768_p11, 1, 0 }
  0x17   : > { %s784_s30 = scalar_lea.hbm %s946_s0, %s451_s27  ;;  %s137_s3 = scalar_lea.vmem [#allocation2], %s434_s26 }
  0x18   : > { %s144_s4 = sshll.u32 %s137_s3, 4  ;;  %p792_p0 = pnand %p486_p13, %p751_p4  ;;  %s788_s4 = int_to_ptr.vmem [resolvable:$true] %s144_s4 }
  0x19   : > { %s134_s6 = scalar_lea.sflag [#allocation3], %s775_s25  ;;  %s540_s7 = scalar_lea.hbm %s784_s30, 256 }
  0x1a   : > { %p541_p2 = scmp.ne.s32.totalorder %s784_s30, %s540_s7  ;;  %p542_p3 = pneg %p792_p0 }
  0x1b   : > { %s545_s16 = scalar_lea.hbm %s946_s0, 512  ;;  %p546_p4 = scmp.lt.u32.totalorder %s784_s30, %s946_s0 }
  0x1c   : > { %p543_p5 = pnand %p542_p3, %p541_p2  ;;  %p547_p7 = scmp.lt.u32.totalorder %s545_s16, %s540_s7 }
  0x1d   : > { %p549_p13 = scmp.lt.u32.totalorder %s540_s7, %s784_s30 }
  0x1e   : > { %p544_p6 = pneg %p543_p5  ;;  %p548_p10 = por %p547_p7, %p546_p4 }
  0x20   : > { %p550_p12 = por %p549_p13, %p548_p10 }
  0x22   : > { %p551_p1 = pnand %p550_p12, %p544_p6 }
  0x24   : > { %554 = shalt.err (!%p551_p1)
}
  0x25   : > { %s555_s20 = scalar_lea.vmem %s788_s4, 256  ;;  %s688_s28 = smov [#allocation2]  }
  0x26   : > { %p556_p2 = scmp.ne.s32.totalorder %s788_s4, %s555_s20  ;;  %s560_s29 = sshll.u32 %s688_s28, 4  ;;  %s561_s29 = int_to_ptr.vmem [resolvable:$false] %s560_s29 }
  0x27   : > { %s562_s3 = scalar_lea.vmem %s561_s29, 512  ;;  %p563_p9 = scmp.lt.s32.totalorder %s788_s4, %s561_s29 }
  0x28   : > { %p558_p5 = pnand %p556_p2, %p542_p3  ;;  %p564_p4 = scmp.lt.s32.totalorder %s562_s3, %s555_s20 }
  0x2a   : > { %p559_p11 = pneg %p558_p5  ;;  %p565_p7 = por %p564_p4, %p563_p9 }
  0x2c   : > { %p566_p10 = pnand %p565_p7, %p559_p11 }
  0x2e   : > { %569 = shalt.err (!%p566_p10)
}
  0x2f   : > { %s689_s7 = smov 128   ;;  %s690_s8 = smov 8  }
  0x30   : > { %478 = dma.hbm_to_vmem [thread:$0]  (!%p792_p0), %s784_s30, 256, %s788_s4, %s134_s6, %s689_s7, %s689_s7, %s690_s8  }
  0x31   : > { %p174_p9 = scmp.lt.s32.totalorder %s686_s14, 3  ;;  %s834_s18 = scalar_lea.hbm %s947_s1, %s451_s27 }
  0x32   : > { %p956_p11 = scmp.ge.s32.totalorder %s686_s14, 1  ;;  %s158_s20 = scalar_lea.vmem [#allocation5], %s434_s26 }
  0x33   : > { %s166_s28 = sshll.u32 %s158_s20, 4  ;;  %s155_s30 = scalar_lea.sflag [#allocation6], %s775_s25  ;;  %s844_s28 = int_to_ptr.vmem [resolvable:$true] %s166_s28 }
  0x34   : > { %p838_p12 = pnand %p956_p11, %p174_p9  ;;  %s570_s4 = scalar_lea.hbm %s834_s18, 256 }
  0x35   : > { %p571_p1 = scmp.ne.s32.totalorder %s834_s18, %s570_s4  ;;  %s575_s29 = scalar_lea.hbm %s947_s1, 512 }
  0x36   : > { %p576_p2 = scmp.lt.u32.totalorder %s834_s18, %s947_s1  ;;  %p577_p5 = scmp.lt.u32.totalorder %s575_s29, %s570_s4 }
  0x37   : > { %p573_p6 = pnand %p571_p1, %p542_p3  ;;  %p579_p7 = scmp.lt.u32.totalorder %s570_s4, %s834_s18 }
  0x38   : > { %p578_p4 = por %p577_p5, %p576_p2 }
  0x39   : > { %p574_p13 = pneg %p573_p6 }
  0x3a   : > { %p580_p10 = por %p579_p7, %p578_p4 }
  0x3c   : > { %p581_p9 = pnand %p580_p10, %p574_p13 }
  0x3e   : > { %584 = shalt.err (!%p581_p9)
}
  0x3f   : > { %s585_s26 = scalar_lea.vmem %s844_s28, 256  ;;  %s691_s16 = smov [#allocation5]  }
  0x40   : > { %p586_p11 = scmp.ne.s32.totalorder %s844_s28, %s585_s26  ;;  %s590_s20 = sshll.u32 %s691_s16, 4  ;;  %s591_s20 = int_to_ptr.vmem [resolvable:$false] %s590_s20 }
  0x41   : > { %s592_s27 = scalar_lea.vmem %s591_s20, 512  ;;  %p593_p8 = scmp.lt.s32.totalorder %s844_s28, %s591_s20 }
  0x42   : > { %p588_p1 = pnand %p586_p11, %p542_p3  ;;  %p594_p2 = scmp.lt.s32.totalorder %s592_s27, %s585_s26 }
  0x44   : > { %p589_p6 = pneg %p588_p1  ;;  %p595_p5 = por %p594_p2, %p593_p8 }
  0x46   : > { %p596_p4 = pnand %p595_p5, %p589_p6 }
  0x48   : > { %599 = shalt.err (!%p596_p4)
}
  0x49   : > { %481 = dma.hbm_to_vmem [thread:$0]  (!%p792_p0), %s834_s18, 256, %s844_s28, %s155_s30, %s689_s7, %s689_s7, %s690_s8  }
  0x4a   : > { %178 = sbr.rel (%p838_p12) target bundleno = 319 (0x13f), region = 28  ;;  %s878_s4 = sand.u32 (!%p838_p12), 1, %s670_s10  }
  0x4b   : > { %s441_s6 = sshll.u32 (!%p838_p12), %s878_s4, 4  ;;  %s181_s29 = scalar_lea.sflag (!%p838_p12), [#allocation3], %s878_s4 }
  0x4c   : > { %s184_s5 = scalar_lea.vmem (!%p838_p12), [#allocation2], %s441_s6  ;;  %p958_p8 = scmp.ne.s32.totalorder (!%p838_p12), %s952_s21, 0 }
  0x51   : > { %653 = dma.done.wait (%p958_p8), %s181_s29, 256  }
  0x52   : > { %655 = vsyncadd (%p958_p8), %s181_s29, 4294967040  ;;  %s190_s25 = scalar_lea.sflag [#allocation6], %s878_s4  ;;  %s193_s7 = scalar_lea.vmem [#allocation5], %s441_s6 }
  0x53   : > { %657 = dma.done.wait (%p958_p8), %s190_s25, 256  }
  0x54   : > { %659 = vsyncadd (%p958_p8), %s190_s25, 4294967040  ;;  %vm223_vm0 = vcmask 130048   ;;  %v221_v0 = vld [vmem:[%s193_s7] sm:$0xff]  ;;  %v222_v1 = vld [vmem:[%s193_s7 + $0x8] sm:$0xff]  ;;  %s218_s8 = scalar_lea.vmem [#allocation7], %s441_s6  ;;  %s453_s19 = sshll.u32 %s678_s12, 8 }
  0x55   : > { %v219_v2 = vld [vmem:[%s184_s5] sm:$0xff]  ;;  %v465_v3 = vpack.c.bf16 %v222_v1, %v221_v0  ;;  %v220_v4 = vld [vmem:[%s184_s5 + $0x8] sm:$0xff]  ;;  %s322_s18 = sshll.u32 %s218_s8, 4  ;;  %s897_s30 = scalar_lea.hbm %s948_s2, %s453_s19  ;;  %s892_s18 = int_to_ptr.vmem [resolvable:$true] %s322_s18 }
  0x56   : > { %462 = vmatprep.mubr.msk.f32.mxu0 %vm223_vm0, %v219_v2  ;;  %s308_s3 = scalar_lea.sflag [#allocation4], %s878_s4  ;;  %s600_s15 = scalar_lea.vmem %s892_s18, 256 }
  0x57   : > { %466 = vmatprep.subr.bf16.mxu0 %v465_v3  ;;  %p601_p0 = scmp.ne.s32.totalorder %s892_s18, %s600_s15  ;;  %p959_p3 = scmp.ne.s32.totalorder %s953_s22, 0 }
  0x58   : > { %468 = vmatpush3.bf16.msra.mxu0 %v465_v3  ;;  %s692_s12 = smov [#allocation7]  }
  0x59   : > { %p602_p12 = pnand %p601_p0, %p959_p3  ;;  %s604_s26 = sshll.u32 %s692_s12, 4  ;;  %s605_s26 = int_to_ptr.vmem [resolvable:$false] %s604_s26 }
  0x5a   : > { %s606_s16 = scalar_lea.vmem %s605_s26, 512  ;;  %p607_p7 = scmp.lt.s32.totalorder %s892_s18, %s605_s26 }
  0x5b   : > { %463 = vmatmul.mubr.msk.f32.vlgmr.msra.gmra.mrb[0].mxu0 %vm223_vm0, %v220_v4  ;;  %p603_p13 = pneg %p602_p12  ;;  %p608_p10 = scmp.lt.s32.totalorder %s606_s16, %s600_s15 }
  0x5d   : > { %p609_p9 = por %p608_p10, %p607_p7 }
  0x5f   : > { %p610_p11 = pnand %p609_p9, %p603_p13 }
 0x12e   : > { %v464_v5 = vpop.f32.mrb[0].mxu0 }
 0x12f   : > { %306 = vst [vmem:[%s218_s8 + $0x8] sm:$0xff] %v464_v5  ;;  %v296_v6 = vpop.f32.mrb[1].mxu0 }
 0x130   : > { %305 = vst [vmem:[%s218_s8] sm:$0xff] %v296_v6 }
 0x131   : > { %613 = shalt.err (!%p610_p11)
}
 0x132   : > { %s614_s20 = scalar_lea.hbm %s897_s30, 256  ;;  %s618_s29 = scalar_lea.hbm %s948_s2, 512 }
 0x133   : > { %p615_p1 = scmp.ne.s32.totalorder %s897_s30, %s614_s20  ;;  %p619_p5 = scmp.lt.u32.totalorder %s897_s30, %s948_s2 }
 0x134   : > { %p620_p4 = scmp.lt.u32.totalorder %s618_s29, %s614_s20  ;;  %p622_p0 = scmp.lt.u32.totalorder %s614_s20, %s897_s30 }
 0x135   : > { %p616_p6 = pnand %p615_p1, %p959_p3 }
 0x136   : > { %p621_p8 = por %p620_p4, %p619_p5 }
 0x137   : > { %p617_p2 = pneg %p616_p6 }
 0x138   : > { %p623_p12 = por %p622_p0, %p621_p8 }
 0x13a   : > { %p624_p13 = pnand %p623_p12, %p617_p2 }
 0x13c   : > { %627 = shalt.err (!%p624_p13)
}
 0x13d   : > { %s693_s7 = smov 128   ;;  %s694_s8 = smov 8  }
 0x13e   : > { %473 = dma.vmem_to_hbm [thread:$0]  (%p959_p3), %s892_s18, 256, %s897_s30, %s308_s3, %s693_s7, %s693_s7, %s694_s8  }
 0x13f PF: > { %s337_s19 = sand.u32 1, %s666_s9   ;;  %p960_p7 = scmp.ne.s32.totalorder %s954_s24, 0 }
 0x140   : > { %p961_p10 = scmp.ge.s32.totalorder %s686_s14, 2  ;;  %s338_s21 = scalar_lea.sflag [#allocation4], %s337_s19 }
 0x142   : > { %p483_p9 = pnand %p961_p10, %p960_p7 }
 0x144   : > { %661 = dma.done.wait (!%p483_p9), %s338_s21, 256  }
 0x145   : > { %663 = vsyncadd (!%p483_p9), %s338_s21, 4294967040  ;;  %s21_s14 = sadd.s32 1, %s686_s14   ;;  %s962_s9 = smov %s670_s10 }
 0x146   : > { %p18_p11 = scmp.ge.s32.totalorder %s21_s14, 4   ;;  %s963_s10 = smov %s674_s11 }
 0x147   : > { %s964_s11 = smov %s766_s23  ;;  %s965_s12 = smov %s682_s13 }
 0x148   : > { %s966_s13 = smov %s968_s17  ;;  %20 = sbr.rel (!%p18_p11) target bundleno = 8 (0x8), region = 86 }
 0x14f   :  { %343 = vsyncpa [#allocation3], 1 }
 0x150   :  { %345 = vsyncpa [#allocation3 + $0x1], 1 }
 0x151   :  { %346 = vsyncpa [#allocation6], 1 }
 0x152   :  { %348 = vsyncpa [#allocation6 + $0x1], 1 }
 0x153   :  { %349 = vsyncpa [#allocation4], 1 }
 0x154   :  { %351 = vsyncpa [#allocation4 + $0x1], 1 }

</bundles_post_ra>
